<compile_context>
chip_gen: v7x
topology: tpu7x:2x2x1
jax: 0.10.0
libtpu: 0.0.40
codegen_flags: <defaults>
</compile_context>

<pallas_src>
import functools

import jax
import jax.numpy as jnp
from jax.experimental import pallas as pl
from jax.experimental.pallas import tpu as pltpu


_MAX_BLOCK_ROWS = 1024
# Inputs below this total (in + out) byte count use the plain-XLA bypass.
_MIN_PALLAS_BYTES = 256 * 1024


def _vmem_plan():
    """(working-set budget bytes, vmem_limit_bytes), generation aware."""
    budget, limit = 20 << 20, 32 << 20          # safe on v5e / v6e / v7x
    try:
        kind = jax.devices()[0].device_kind.lower()
        if "v6" in kind:                         # 128 MiB physical VMEM
            budget, limit = 40 << 20, 64 << 20
    except Exception:  # pragma: no cover - backend probing is best-effort
        pass
    return budget, limit


def _row_multiple(itemsize: int) -> int:
    # Sub-32-bit dtypes pack along sublanes: keep row tiles fully packed.
    return {4: 8, 2: 16, 1: 32}.get(itemsize, 8)


def _copy_kernel_aligned(x_ref, o_ref, *, copies_per_step, d):
    # d % 128 == 0: each per-copy store targets a lane-aligned sub-range of the
    # output slab (unmasked vst). Re-read x_ref per store: VMEM->VMEM streaming,
    # no long vreg live range across the unrolled copies.
    for k in range(copies_per_step):
        o_ref[:, k * d:(k + 1) * d] = x_ref[...]


def _copy_kernel_packed(x_ref, o_ref, *, copies_per_step):
    # d not a lane multiple: build the full (bn, c*d) slab once and issue a
    # single lane-dense full-block store instead of c masked sub-stores.
    o_ref[...] = jnp.concatenate([x_ref[...]] * copies_per_step, axis=1)


def _choose_tiling(n, d, num_copies, itemsize, budget, max_rows):
    """Pick (rows per tile, copies packed per grid step); None if nothing fits."""
    row_mult = _row_multiple(itemsize)

    def fits(rows, c):
        # input block + output block, double-buffered.
        return 2 * rows * d * (1 + c) * itemsize <= budget

    divisors = [c for c in range(1, num_copies + 1) if num_copies % c == 0]
    aligned = [c for c in divisors if (c * d) % 128 == 0]
    # If no lane-aligned packing exists, the only legal output block width is
    # the full output width (full dim lifts the 128-lane requirement).
    candidates = sorted(aligned, reverse=True) if aligned else [num_copies]

    if n <= max_rows:
        bn = n                       # full dim lifts the sublane requirement
    else:
        bn = max(row_mult, (max_rows // row_mult) * row_mult)

    while True:
        for c in candidates:
            if fits(bn, c):
                return bn, c
        if bn <= row_mult:
            return None              # nothing fits scoped VMEM -> XLA fallback
        bn = max(row_mult, ((bn // 2) // row_mult) * row_mult)


def multi_identity(x: jnp.ndarray, num_copies: int, *,
                   min_pallas_bytes: int = _MIN_PALLAS_BYTES,
                   max_block_rows: int = _MAX_BLOCK_ROWS) -> jnp.ndarray:
    """Tile x (N, D) along the feature axis -> (N, D * num_copies)."""
    n, d = x.shape
    itemsize = jnp.dtype(x.dtype).itemsize
    total_bytes = (1 + num_copies) * n * d * itemsize

    if num_copies == 1:
        return x
    if total_bytes < min_pallas_bytes:
        # pallas_call fixed overhead dominates tiny copies; XLA's fused tile
        # already hits the HBM roofline here.
        return jnp.tile(x, (1, num_copies))

    budget, vmem_limit = _vmem_plan()
    tiling = _choose_tiling(n, d, num_copies, itemsize, budget, max_block_rows)
    if tiling is None:
        # No legal (8,128)-compatible block fits scoped VMEM (huge,
        # lane-misaligned D*num_copies): robust fallback instead of OOM.
        return jnp.tile(x, (1, num_copies))
    bn, c = tiling

    if d % 128 == 0:
        kernel = functools.partial(_copy_kernel_aligned, copies_per_step=c, d=d)
    else:
        kernel = functools.partial(_copy_kernel_packed, copies_per_step=c)

    grid = (pl.cdiv(n, bn), num_copies // c)     # copies innermost

    return pl.pallas_call(
        kernel,
        out_shape=jax.ShapeDtypeStruct((n, d * num_copies), x.dtype),
        grid_spec=pltpu.PrefetchScalarGridSpec(
            num_scalar_prefetch=0,
            grid=grid,
            # Input block index is constant along the inner (copy) axis, so the
            # VMEM-resident tile is reused without re-fetching across copies.
            in_specs=[pl.BlockSpec((bn, d), lambda i, j: (i, 0))],
            # j-th inner step fills the j-th wide (bn, c*d) slab of the output.
            out_specs=pl.BlockSpec((bn, c * d), lambda i, j: (i, j)),
        ),
        compiler_params=pltpu.CompilerParams(
            # Rows shard across TensorCores; copy axis stays on one core so the
            # input tile is never fetched twice.
            dimension_semantics=("parallel", "arbitrary"),
            vmem_limit_bytes=vmem_limit,
        ),
    )(x)


if __name__ == "__main__":
    key = jax.random.PRNGKey(0)

    # 1) Tiny input: served by the jnp.tile bypass (kernel overhead not worth it).
    x0 = jax.random.normal(key, (8, 128), dtype=jnp.float32)
    out0 = jax.block_until_ready(multi_identity(x0, 4))
    assert out0.shape == (8, 512), out0.shape
    assert jnp.array_equal(out0, jnp.tile(x0, (1, 4))), "bypass mismatch"

    # 2) Same input forced through the Pallas kernel (aligned-D per-copy stores).
    out1 = jax.block_until_ready(multi_identity(x0, 4, min_pallas_bytes=0))
    assert jnp.array_equal(out1, jnp.tile(x0, (1, 4))), "aligned kernel mismatch"

    # 3) Lane-misaligned D (=64): packed single-store kernel path.
    x2 = jax.random.normal(key, (16, 64), dtype=jnp.float32)
    out2 = jax.block_until_ready(multi_identity(x2, 4, min_pallas_bytes=0))
    assert out2.shape == (16, 256), out2.shape
    assert jnp.array_equal(out2, jnp.tile(x2, (1, 4))), "packed kernel mismatch"

    # 4) Row-tiled path (grid > 1 along rows) with bf16 sublane packing.
    x3 = jax.random.normal(key, (64, 128), dtype=jnp.bfloat16)
    out3 = jax.block_until_ready(
        multi_identity(x3, 8, min_pallas_bytes=0, max_block_rows=16))
    assert out3.shape == (64, 1024), out3.shape
    assert jnp.array_equal(out3, jnp.tile(x3, (1, 8))), "row-tiled mismatch"

    print("KERNEL_OK")
</pallas_src>

<mosaic_0001>
module attributes {stable_mosaic.version = 11 : i64} {
  func.func @_copy_kernel_aligned(%arg0: i32, %arg1: i32, %arg2: memref<8x128xf32, #tpu.memory_space<vmem>>, %arg3: memref<8x512xf32, #tpu.memory_space<vmem>>) attributes {dimension_semantics = [#tpu.dimension_semantics<parallel>, #tpu.dimension_semantics<arbitrary>], iteration_bounds = array<i64: 1, 1>, scalar_prefetch = 0 : i64, scratch_operands = 0 : i64, tpu.core_type = #tpu.core_type<tc>, window_params = [{transform_indices = @transform_0, window_bounds = array<i64: 8, 128>}, {transform_indices = @transform_1, window_bounds = array<i64: 8, 512>}]} {
    %c0 = arith.constant 0 : index
    %c0_0 = arith.constant 0 : index
    %0 = vector.load %arg2[%c0, %c0_0] : memref<8x128xf32, #tpu.memory_space<vmem>>, vector<8x128xf32>
    %c0_1 = arith.constant 0 : index
    %c0_2 = arith.constant 0 : index
    %1 = vector.load %arg3[%c0_1, %c0_2] : memref<8x512xf32, #tpu.memory_space<vmem>>, vector<8x128xf32>
    tpu.vector_store %arg3[%c0_1, %c0_2], %0 {strides = array<i32>} : memref<8x512xf32, #tpu.memory_space<vmem>>, vector<8x128xf32>,
    %c0_3 = arith.constant 0 : index
    %c0_4 = arith.constant 0 : index
    %2 = vector.load %arg2[%c0_3, %c0_4] : memref<8x128xf32, #tpu.memory_space<vmem>>, vector<8x128xf32>
    %c0_5 = arith.constant 0 : index
    %c128 = arith.constant 128 : index
    %3 = vector.load %arg3[%c0_5, %c128] : memref<8x512xf32, #tpu.memory_space<vmem>>, vector<8x128xf32>
    tpu.vector_store %arg3[%c0_5, %c128], %2 {strides = array<i32>} : memref<8x512xf32, #tpu.memory_space<vmem>>, vector<8x128xf32>,
    %c0_6 = arith.constant 0 : index
    %c0_7 = arith.constant 0 : index
    %4 = vector.load %arg2[%c0_6, %c0_7] : memref<8x128xf32, #tpu.memory_space<vmem>>, vector<8x128xf32>
    %c0_8 = arith.constant 0 : index
    %c256 = arith.constant 256 : index
    %5 = vector.load %arg3[%c0_8, %c256] : memref<8x512xf32, #tpu.memory_space<vmem>>, vector<8x128xf32>
    tpu.vector_store %arg3[%c0_8, %c256], %4 {strides = array<i32>} : memref<8x512xf32, #tpu.memory_space<vmem>>, vector<8x128xf32>,
    %c0_9 = arith.constant 0 : index
    %c0_10 = arith.constant 0 : index
    %6 = vector.load %arg2[%c0_9, %c0_10] : memref<8x128xf32, #tpu.memory_space<vmem>>, vector<8x128xf32>
    %c0_11 = arith.constant 0 : index
    %c384 = arith.constant 384 : index
    %7 = vector.load %arg3[%c0_11, %c384] : memref<8x512xf32, #tpu.memory_space<vmem>>, vector<8x128xf32>
    tpu.vector_store %arg3[%c0_11, %c384], %6 {strides = array<i32>} : memref<8x512xf32, #tpu.memory_space<vmem>>, vector<8x128xf32>,
    return
  }
  func.func @transform_0(%arg0: i32, %arg1: i32) -> (i32, i32) {
    %c0_i32 = arith.constant 0 : i32
    %c0_i32_0 = arith.constant 0 : i32
    return %arg0, %c0_i32 : i32, i32
  }
  func.func @transform_1(%arg0: i32, %arg1: i32) -> (i32, i32) {
    %c0_i32 = arith.constant 0 : i32
    return %arg0, %arg1 : i32, i32
  }
}

</mosaic_0001>

<bundles_post_ra>
// kernel: tpu_custom_call.1
= control target key start
LH: loop header
LB: loop body
LE: loop exit
PB: predicated region body
PF: predicated region fallthrough
CT: control target
= control target key end

     0   :  { %6 = vsyncpa [#allocation3], 0  ;;  %s130_s0 = inlined_call_operand.hbm [shape: f32[8,128], index: 0, kind: input, shape index: {}]   ;;  %s131_s1 = inlined_call_operand.hbm [shape: f32[8,512], index: 1, kind: output, shape index: {}]  }
   0x1   :  { %7 = vsyncpa [#allocation4], 0  ;;  %s94_s6 = smov [#allocation2]   ;;  %s46_s10 = scalar_lea.hbm %s130_s0, 128 }
   0x2   :  { %s14_s7 = sshll.u32 %s94_s6, 4  ;;  %p47_p0 = scmp.ne.s32.totalorder %s130_s0, %s46_s10  ;;  %s15_s7 = int_to_ptr.vmem [resolvable:$true] %s14_s7 }
   0x3   :  { %p50_p1 = scmp.lt.u32.totalorder %s46_s10, %s130_s0 }
   0x5   :  { %p52_p2 = pnand %p50_p1, %p47_p0 }
   0x7   :  { %55 = shalt.err (!%p52_p2)
}
   0x8   :  { %s56_s15 = scalar_lea.vmem %s15_s7, 128  ;;  %p61_p4 = scmp.lt.s32.totalorder %s15_s7, %s15_s7 }
   0x9   :  { %p57_p3 = scmp.ne.s32.totalorder %s15_s7, %s56_s15  ;;  %p62_p5 = scmp.lt.s32.totalorder %s56_s15, %s56_s15 }
   0xb   :  { %p63_p6 = por %p62_p5, %p61_p4 }
   0xd   :  { %p64_p7 = pnand %p63_p6, %p57_p3 }
   0xf   :  { %67 = shalt.err (!%p64_p7)
}
  0x10   :  { %17 = dma.hbm_to_vmem [thread:$0]  %s130_s0, 128, %s15_s7, [#allocation3]  }
  0x11   :  { %90 = dma.done.wait [#allocation3], 128  }
  0x12   :  { %91 = vsyncadd [#allocation3], 4294967168  ;;  %s95_s18 = smov [#allocation5]   ;;  %v21_v0 = vld [vmem:[#allocation2] sm:$0xff] }
  0x13   :  { %s35_s19 = sshll.u32 %s95_s18, 4  ;;  %22 = vst [vmem:[#allocation5] sm:$0xff] %v21_v0  ;;  %24 = vst [vmem:[#allocation5 + $0x8] sm:$0xff] %v21_v0  ;;  %s36_s19 = int_to_ptr.vmem [resolvable:$true] %s35_s19 }
  0x14   :  { %26 = vst [vmem:[#allocation5 + $0x10] sm:$0xff] %v21_v0  ;;  %28 = vst [vmem:[#allocation5 + $0x18] sm:$0xff] %v21_v0  ;;  %s68_s20 = scalar_lea.vmem %s36_s19, 512  ;;  %p73_p9 = scmp.lt.s32.totalorder %s36_s19, %s36_s19 }
  0x15   :  { %p69_p8 = scmp.ne.s32.totalorder %s36_s19, %s68_s20  ;;  %p74_p10 = scmp.lt.s32.totalorder %s68_s20, %s68_s20 }
  0x17   :  { %p75_p11 = por %p74_p10, %p73_p9 }
  0x19   :  { %p76_p12 = pnand %p75_p11, %p69_p8 }
  0x1b   :  { %79 = shalt.err (!%p76_p12)
}
  0x1c   :  { %s80_s0 = scalar_lea.hbm %s131_s1, 512 }
  0x1d   :  { %p81_p13 = scmp.ne.s32.totalorder %s131_s1, %s80_s0  ;;  %p84_p0 = scmp.lt.u32.totalorder %s80_s0, %s131_s1 }
  0x1f   :  { %p86_p1 = pnand %p84_p0, %p81_p13 }
  0x21   :  { %89 = shalt.err (!%p86_p1)
}
  0x22   :  { %38 = dma.vmem_to_hbm [thread:$0]  %s36_s19, 512, %s131_s1, [#allocation4]  }
  0x23   :  { %92 = dma.done.wait [#allocation4], 512  }
  0x24   :  { %93 = vsyncadd [#allocation4], 4294966784 }
  0x25   :  { %42 = vsyncpa [#allocation3], 1 }
  0x26   :  { %43 = vsyncpa [#allocation4], 1 }

</bundles_post_ra>
